<compile_context>
chip_gen: v6e
topology: v6e:2x2x1
jax: 0.10.0
libtpu: 0.0.40
codegen_flags: <defaults>
</compile_context>

<pallas_src>
import functools

import jax
import jax.numpy as jnp
from jax.experimental import pallas as pl
from jax.experimental.pallas import tpu as pltpu

N_OBS = 11
N_ACTIONS = 3
HIDDEN = 128
OUT_PAD = 128          # lane-dense padded width for the final layer output
LN_EPS = 1e-5          # torch.nn.functional.layer_norm default
LEAKY_SLOPE = 0.01     # torch.nn.functional.leaky_relu default

# ---- packed parameter buffer layout (all row offsets are multiples of 8) ----
X_FEAT_PAD = 16                      # w1 segment height (ceil(11/8)*8)
W1_R0, W1_R1 = 0, 16                 # w1  [16, 128]   (rows 11..15 zero)
B1_R0, B1_R1 = 16, 24                # b1  row 16      (rows 17..23 zero)
W2_R0, W2_R1 = 24, 152               # w2  [128, 128]
B2_R0, B2_R1 = 152, 160              # b2  row 152
W3_R0, W3_R1 = 160, 288              # w3  [128, 128]  (output cols padded to 128)
B3_R0, B3_R1 = 288, 296              # b3  row 288
PACK_ROWS = 296
PACK_COLS = 128


def _leaky_relu(h):
    # slope in (0,1) => max(h, slope*h) == leaky_relu(h)
    return jnp.maximum(h, LEAKY_SLOPE * h)


def _masked_layer_norm_all(h, mask, inv_n):
    """F.layer_norm(h, h.size()) over the VALID rows only (mask = 1 for real rows).

    Single fused reduction pass: s1 = sum(m*h), s2 = sum(m*h*h),
    mu = s1/N, var = s2/N - mu^2 with N = B_real*HIDDEN (static).
    Padded rows do not contribute to the statistics; the normalization is
    applied to all rows (padded rows are sliced away by the wrapper).
    """
    hm = h * mask
    s1 = jnp.sum(hm)
    s2 = jnp.sum(hm * h)
    mu = s1 * inv_n
    var = jnp.maximum(s2 * inv_n - mu * mu, 0.0)   # guard cancellation
    return (h - mu) * jax.lax.rsqrt(var + LN_EPS)


def actor_kernel(x_ref, p_ref, out_ref, *, b_real):
    x = x_ref[...].astype(jnp.float32)                       # [B_pad, 16]
    b_pad = x.shape[0]

    # Static, 8-row-aligned views into the single packed parameter buffer.
    w1 = p_ref[W1_R0:W1_R1, :]                                # [16, 128]
    b1 = p_ref[B1_R0:B1_R0 + 1, :]                            # [1, 128]
    w2 = p_ref[W2_R0:W2_R1, :]                                # [128, 128]
    b2 = p_ref[B2_R0:B2_R0 + 1, :]                            # [1, 128]
    w3 = p_ref[W3_R0:W3_R1, :]                                # [128, 128]
    b3 = p_ref[B3_R0:B3_R0 + 1, :]                            # [1, 128]

    # Row mask for the whole-tensor LN statistics (padded rows excluded).
    row_ids = jax.lax.broadcasted_iota(jnp.int32, (b_pad, 1), 0)
    mask = (row_ids < b_real).astype(jnp.float32)             # [B_pad, 1]
    inv_n = jnp.float32(1.0 / (b_real * HIDDEN))

    # fc_layer
    h = jnp.dot(x, w1, preferred_element_type=jnp.float32) + b1
    h = _masked_layer_norm_all(h, mask, inv_n)
    h = _leaky_relu(h)

    # hidden_layer
    h = jnp.dot(h, w2, preferred_element_type=jnp.float32) + b2
    h = _masked_layer_norm_all(h, mask, inv_n)
    h = _leaky_relu(h)

    # fc_pi (lane-dense output: padded to OUT_PAD columns, extra cols are zero)
    pref = jnp.dot(h, w3, preferred_element_type=jnp.float32) + b3
    out_ref[...] = pref.astype(out_ref.dtype)


def actor_forward(x, packed_params):
    """x: [B, N_OBS] float32.  packed_params: [PACK_ROWS, PACK_COLS] float32.

    Returns [B, N_ACTIONS] action preferences (exact PyTorch Actor.forward).
    """
    B = x.shape[0]
    b_pad = max(8, ((B + 7) // 8) * 8)

    # Pad batch to a full sublane tile and features to the w1 segment height.
    x_pad = jnp.zeros((b_pad, X_FEAT_PAD), dtype=jnp.float32)
    x_pad = x_pad.at[:B, :N_OBS].set(x.astype(jnp.float32))

    vmem = pl.BlockSpec(memory_space=pltpu.MemorySpace.VMEM)
    out_padded = pl.pallas_call(
        functools.partial(actor_kernel, b_real=B),
        out_shape=jax.ShapeDtypeStruct((b_pad, OUT_PAD), jnp.float32),
        in_specs=[vmem, vmem],
        out_specs=vmem,
    )(x_pad, packed_params)
    return out_padded[:B, :N_ACTIONS]


# ---------------------------------------------------------------------------
# Parameter construction / packing
# ---------------------------------------------------------------------------
def _sparse_linear_init(key, in_features, out_features, sparsity=0.9):
    """Deterministic stand-in for sparse_init: normal weights with `sparsity`
    fraction zeroed; bias = 0 (as in initialize_weights).  Returned transposed
    ([in, out]) so the kernel does plain row-major x @ W."""
    k_w, k_m = jax.random.split(key)
    w = jax.random.normal(k_w, (out_features, in_features), dtype=jnp.float32) * 0.1
    keep = jax.random.uniform(k_m, (out_features, in_features)) >= sparsity
    w = w * keep.astype(jnp.float32)
    b = jnp.zeros((out_features,), dtype=jnp.float32)
    return w.T, b                                            # [in, out], [out]


def make_params(key):
    k1, k2, k3 = jax.random.split(key, 3)
    w1, b1 = _sparse_linear_init(k1, N_OBS, HIDDEN)          # [11, 128]
    w2, b2 = _sparse_linear_init(k2, HIDDEN, HIDDEN)         # [128, 128]
    w3, b3 = _sparse_linear_init(k3, HIDDEN, N_ACTIONS)      # [128, 3]

    # Pack everything into one sublane-aligned buffer.  w3/b3 are zero-padded
    # to OUT_PAD output lanes so the kernel's final store is lane-dense.
    buf = jnp.zeros((PACK_ROWS, PACK_COLS), dtype=jnp.float32)
    buf = buf.at[W1_R0:W1_R0 + N_OBS, :HIDDEN].set(w1)
    buf = buf.at[B1_R0, :HIDDEN].set(b1)
    buf = buf.at[W2_R0:W2_R1, :HIDDEN].set(w2)
    buf = buf.at[B2_R0, :HIDDEN].set(b2)
    buf = buf.at[W3_R0:W3_R1, :N_ACTIONS].set(w3)
    buf = buf.at[B3_R0, :N_ACTIONS].set(b3)

    return {"packed": buf,
            "w1": w1, "b1": b1, "w2": w2, "b2": b2, "w3": w3, "b3": b3}


# ---------------------------------------------------------------------------
# Pure-JAX reference (mirrors the PyTorch forward, two-pass LN, no padding)
# ---------------------------------------------------------------------------
def _layer_norm_all_ref(h):
    mu = jnp.mean(h)
    var = jnp.mean((h - mu) * (h - mu))
    return (h - mu) * jax.lax.rsqrt(var + LN_EPS)


def _reference(x, p):
    h = x @ p["w1"] + p["b1"]
    h = _layer_norm_all_ref(h)
    h = _leaky_relu(h)
    h = h @ p["w2"] + p["b2"]
    h = _layer_norm_all_ref(h)
    h = _leaky_relu(h)
    return h @ p["w3"] + p["b3"]


if __name__ == "__main__":
    key = jax.random.PRNGKey(0)
    k_x, k_p = jax.random.split(key)

    B = 4  # small batch; F.layer_norm(x, x.size()) normalizes jointly over B and features
    x = jax.random.normal(k_x, (B, N_OBS), dtype=jnp.float32)
    params = make_params(k_p)

    out = actor_forward(x, params["packed"])
    out = jax.block_until_ready(out)

    ref = _reference(x, params)
    assert out.shape == (B, N_ACTIONS)
    assert jnp.allclose(out, ref, atol=1e-4, rtol=1e-4), "mismatch vs reference"

    print("KERNEL_OK")
</pallas_src>

<mosaic_0001>
module attributes {stable_mosaic.version = 11 : i64} {
  func.func @actor_kernel(%arg0: memref<8x16xf32, #tpu.memory_space<vmem>>, %arg1: memref<296x128xf32, #tpu.memory_space<vmem>>, %arg2: memref<8x128xf32, #tpu.memory_space<vmem>>) attributes {dimension_semantics = [], scalar_prefetch = 0 : i64, scratch_operands = 0 : i64, tpu.core_type = #tpu.core_type<tc>} {
    %c0 = arith.constant 0 : index
    %c0_0 = arith.constant 0 : index
    %0 = vector.load %arg0[%c0, %c0_0] : memref<8x16xf32, #tpu.memory_space<vmem>>, vector<8x16xf32>
    %c0_1 = arith.constant 0 : index
    %c0_2 = arith.constant 0 : index
    %1 = vector.load %arg1[%c0_1, %c0_2] : memref<296x128xf32, #tpu.memory_space<vmem>>, vector<16x128xf32>
    %c16 = arith.constant 16 : index
    %c0_3 = arith.constant 0 : index
    %2 = vector.load %arg1[%c16, %c0_3] : memref<296x128xf32, #tpu.memory_space<vmem>>, vector<1x128xf32>
    %c24 = arith.constant 24 : index
    %c0_4 = arith.constant 0 : index
    %3 = vector.load %arg1[%c24, %c0_4] : memref<296x128xf32, #tpu.memory_space<vmem>>, vector<128x128xf32>
    %c152 = arith.constant 152 : index
    %c0_5 = arith.constant 0 : index
    %4 = vector.load %arg1[%c152, %c0_5] : memref<296x128xf32, #tpu.memory_space<vmem>>, vector<1x128xf32>
    %c160 = arith.constant 160 : index
    %c0_6 = arith.constant 0 : index
    %5 = vector.load %arg1[%c160, %c0_6] : memref<296x128xf32, #tpu.memory_space<vmem>>, vector<128x128xf32>
    %c288 = arith.constant 288 : index
    %c0_7 = arith.constant 0 : index
    %6 = vector.load %arg1[%c288, %c0_7] : memref<296x128xf32, #tpu.memory_space<vmem>>, vector<1x128xf32>
    %7 = tpu.iota {dimensions = array<i32: 0>} : vector<8x1xi32>
    %c4_i32 = arith.constant 4 : i32
    %8 = vector.broadcast %c4_i32 : i32 to vector<8x1xi32>
    %9 = arith.cmpi slt, %7, %8 : vector<8x1xi32>
    %10 = arith.extui %9 : vector<8x1xi1> to vector<8x1xi32>
    %11 = arith.sitofp %10 : vector<8x1xi32> to vector<8x1xf32>
    %cst = arith.constant dense<0.000000e+00> : vector<8x128xf32>
    %12 = tpu.matmul %0, %1, %cst {dimension_numbers = #tpu.dot_dimension_numbers<[1], [0], [0], [1], [0, 0, 1, 1], [], []>} : vector<8x16xf32>, vector<16x128xf32>, vector<8x128xf32> -> vector<8x128xf32>
    %13 = vector.broadcast %2 : vector<1x128xf32> to vector<8x128xf32>
    %14 = arith.addf %12, %13 : vector<8x128xf32>
    %15 = vector.broadcast %11 : vector<8x1xf32> to vector<8x128xf32>
    %16 = arith.mulf %14, %15 : vector<8x128xf32>
    %17 = vector.shape_cast %16 : vector<8x128xf32> to vector<1x8x128xf32>
    %cst_8 = arith.constant dense<0.000000e+00> : vector<1xf32>
    %18 = vector.multi_reduction <add>, %17, %cst_8 [1, 2] : vector<1x8x128xf32> to vector<1xf32>
    %19 = vector.shape_cast %18 : vector<1xf32> to vector<1x1x1xf32>
    %20 = vector.extract %19[0, 0, 0] : f32 from vector<1x1x1xf32>
    %21 = arith.mulf %16, %14 : vector<8x128xf32>
    %22 = vector.shape_cast %21 : vector<8x128xf32> to vector<1x8x128xf32>
    %cst_9 = arith.constant dense<0.000000e+00> : vector<1xf32>
    %23 = vector.multi_reduction <add>, %22, %cst_9 [1, 2] : vector<1x8x128xf32> to vector<1xf32>
    %24 = vector.shape_cast %23 : vector<1xf32> to vector<1x1x1xf32>
    %25 = vector.extract %24[0, 0, 0] : f32 from vector<1x1x1xf32>
    %cst_10 = arith.constant 0.001953125 : f32
    %26 = arith.mulf %20, %cst_10 : f32
    %cst_11 = arith.constant 0.001953125 : f32
    %27 = arith.mulf %25, %cst_11 : f32
    %28 = arith.mulf %26, %26 : f32
    %29 = arith.subf %27, %28 : f32
    %cst_12 = arith.constant 0.000000e+00 : f32
    %30 = arith.maximumf %29, %cst_12 : f32
    %31 = vector.broadcast %26 : f32 to vector<8x128xf32>
    %32 = arith.subf %14, %31 : vector<8x128xf32>
    %cst_13 = arith.constant 9.99999974E-6 : f32
    %33 = arith.addf %30, %cst_13 : f32
    %34 = math.rsqrt %33 : f32
    %35 = vector.broadcast %34 : f32 to vector<8x128xf32>
    %36 = arith.mulf %32, %35 : vector<8x128xf32>
    %cst_14 = arith.constant 0.00999999977 : f32
    %37 = vector.broadcast %cst_14 : f32 to vector<8x128xf32>
    %38 = arith.mulf %37, %36 : vector<8x128xf32>
    %39 = arith.maximumf %36, %38 : vector<8x128xf32>
    %cst_15 = arith.constant dense<0.000000e+00> : vector<8x128xf32>
    %40 = tpu.matmul %39, %3, %cst_15 {dimension_numbers = #tpu.dot_dimension_numbers<[1], [0], [0], [1], [0, 0, 1, 1], [], []>} : vector<8x128xf32>, vector<128x128xf32>, vector<8x128xf32> -> vector<8x128xf32>
    %41 = vector.broadcast %4 : vector<1x128xf32> to vector<8x128xf32>
    %42 = arith.addf %40, %41 : vector<8x128xf32>
    %43 = vector.broadcast %11 : vector<8x1xf32> to vector<8x128xf32>
    %44 = arith.mulf %42, %43 : vector<8x128xf32>
    %45 = vector.shape_cast %44 : vector<8x128xf32> to vector<1x8x128xf32>
    %cst_16 = arith.constant dense<0.000000e+00> : vector<1xf32>
    %46 = vector.multi_reduction <add>, %45, %cst_16 [1, 2] : vector<1x8x128xf32> to vector<1xf32>
    %47 = vector.shape_cast %46 : vector<1xf32> to vector<1x1x1xf32>
    %48 = vector.extract %47[0, 0, 0] : f32 from vector<1x1x1xf32>
    %49 = arith.mulf %44, %42 : vector<8x128xf32>
    %50 = vector.shape_cast %49 : vector<8x128xf32> to vector<1x8x128xf32>
    %cst_17 = arith.constant dense<0.000000e+00> : vector<1xf32>
    %51 = vector.multi_reduction <add>, %50, %cst_17 [1, 2] : vector<1x8x128xf32> to vector<1xf32>
    %52 = vector.shape_cast %51 : vector<1xf32> to vector<1x1x1xf32>
    %53 = vector.extract %52[0, 0, 0] : f32 from vector<1x1x1xf32>
    %cst_18 = arith.constant 0.001953125 : f32
    %54 = arith.mulf %48, %cst_18 : f32
    %cst_19 = arith.constant 0.001953125 : f32
    %55 = arith.mulf %53, %cst_19 : f32
    %56 = arith.mulf %54, %54 : f32
    %57 = arith.subf %55, %56 : f32
    %cst_20 = arith.constant 0.000000e+00 : f32
    %58 = arith.maximumf %57, %cst_20 : f32
    %59 = vector.broadcast %54 : f32 to vector<8x128xf32>
    %60 = arith.subf %42, %59 : vector<8x128xf32>
    %cst_21 = arith.constant 9.99999974E-6 : f32
    %61 = arith.addf %58, %cst_21 : f32
    %62 = math.rsqrt %61 : f32
    %63 = vector.broadcast %62 : f32 to vector<8x128xf32>
    %64 = arith.mulf %60, %63 : vector<8x128xf32>
    %cst_22 = arith.constant 0.00999999977 : f32
    %65 = vector.broadcast %cst_22 : f32 to vector<8x128xf32>
    %66 = arith.mulf %65, %64 : vector<8x128xf32>
    %67 = arith.maximumf %64, %66 : vector<8x128xf32>
    %cst_23 = arith.constant dense<0.000000e+00> : vector<8x128xf32>
    %68 = tpu.matmul %67, %5, %cst_23 {dimension_numbers = #tpu.dot_dimension_numbers<[1], [0], [0], [1], [0, 0, 1, 1], [], []>} : vector<8x128xf32>, vector<128x128xf32>, vector<8x128xf32> -> vector<8x128xf32>
    %69 = vector.broadcast %6 : vector<1x128xf32> to vector<8x128xf32>
    %70 = arith.addf %68, %69 : vector<8x128xf32>
    %c0_24 = arith.constant 0 : index
    %c0_25 = arith.constant 0 : index
    %71 = vector.load %arg2[%c0_24, %c0_25] : memref<8x128xf32, #tpu.memory_space<vmem>>, vector<8x128xf32>
    tpu.vector_store %arg2[%c0_24, %c0_25], %70 {strides = array<i32>} : memref<8x128xf32, #tpu.memory_space<vmem>>, vector<8x128xf32>,
    return
  }
}

</mosaic_0001>

<bundles_post_ra>
// kernel: tpu_custom_call.1
= control target key start
LH: loop header
LB: loop body
LE: loop exit
PB: predicated region body
PF: predicated region fallthrough
CT: control target
= control target key end

     0   :  { %7 = vsyncpa [#allocation3], 0  ;;  %s689_s0 = inlined_call_operand.hbm [shape: f32[8,16], index: 0, kind: input, shape index: {}]   ;;  %s690_s1 = inlined_call_operand.hbm [shape: f32[296,128], index: 1, kind: input, shape index: {}]   ;;  %s691_s2 = inlined_call_operand.hbm [shape: f32[8,128], index: 2, kind: output, shape index: {}]  }
   0x1   :  { %8 = vsyncpa [#allocation6], 0 }
   0x2   :  { %9 = vsyncpa [#allocation4], 0  ;;  %s603_s9 = smov [#allocation2]   ;;  %s604_s11 = smov [#allocation5]  }
   0x3   :  { %s16_s10 = sshll.u32 %s603_s9, 4  ;;  %s25_s12 = sshll.u32 %s604_s11, 4  ;;  %s17_s10 = int_to_ptr.vmem [resolvable:$true] %s16_s10  ;;  %s26_s12 = int_to_ptr.vmem [resolvable:$true] %s25_s12 }
   0x4   :  { %s545_s13 = scalar_lea.vmem %s17_s10, 128  ;;  %p550_p1 = scmp.lt.s32.totalorder %s17_s10, %s17_s10 }
   0x5   :  { %p546_p0 = scmp.ne.s32.totalorder %s17_s10, %s545_s13  ;;  %p551_p2 = scmp.lt.s32.totalorder %s545_s13, %s545_s13 }
   0x7   :  { %p552_p3 = por %p551_p2, %p550_p1 }
   0x9   :  { %p553_p4 = pnand %p552_p3, %p546_p0 }
   0xb   :  { %556 = shalt.err (!%p553_p4)
}
   0xc   :  { %19 = dma.hbm_to_vmem [thread:$0]  %s689_s0, 128, %s17_s10, [#allocation3]  }
   0xd   :  { %s565_s16 = scalar_lea.vmem %s26_s12, 4736  ;;  %p570_p6 = scmp.lt.s32.totalorder %s26_s12, %s26_s12 }
   0xe   :  { %p566_p5 = scmp.ne.s32.totalorder %s26_s12, %s565_s16  ;;  %p571_p7 = scmp.lt.s32.totalorder %s565_s16, %s565_s16 }
  0x10   :  { %p572_p8 = por %p571_p7, %p570_p6 }
  0x12   :  { %p573_p9 = pnand %p572_p8, %p566_p5 }
  0x14   :  { %576 = shalt.err (!%p573_p9)
}
  0x15   :  { %s605_s17 = smov 128   ;;  %s606_s18 = smov 8  }
  0x16   :  { %31 = dma.hbm_to_vmem [thread:$0]  %s690_s1, 4736, %s26_s12, [#allocation6], %s605_s17, %s605_s17, %s606_s18  }
  0x17   :  { %597 = dma.done.wait [#allocation3], 128  }
  0x18   :  { %598 = vsyncadd [#allocation3], 4294967168 }
  0x19   :  { %599 = dma.done.wait [#allocation6], 4736  }
  0x1a   :  { %600 = vsyncadd [#allocation6], 4294962560  ;;  %v607_v0 = vmov 0.0   ;;  %vm608_vm0 = vmmov 0   ;;  %v40_v1 = vld [vmem:[#allocation5 + $0x8] sm:$0xff]  ;;  %v39_v2 = vld [vmem:[#allocation5] sm:$0xff]  ;;  %v76_v4 = vlaneseq }
  0x1b   :  { %436 = vmatprep.subr.mxu0 %v607_v0  ;;  %440 = vmatprep.mubr.msk.f32.mxu0 %vm608_vm0, %v607_v0  ;;  %v38_v3 = vld [vmem:[#allocation2] sm:$0xff]  ;;  %vm85_vm1 = vcmask 130048   ;;  %v395_v6 = vld [vmem:[#allocation5 + $0x10] ss:$0 sm:$0xff]  ;;  %v56_v14 = vld [vmem:[#allocation5 + $0x88] sm:$0xff]  ;;  %s609_s25 = smov 0.0  }
  0x1c   :  { %443 = vmatprep.subr.mxu1 %v607_v0  ;;  %475 = vmatprep.mubr.msk.f32.mxu1 %vm608_vm0, %v607_v0  ;;  %v77_v5 = vshrl.u32 %v76_v4, 7  ;;  %v57_v13 = vld [vmem:[#allocation5 + $0x90] sm:$0xff]  ;;  %v55_v15 = vld [vmem:[#allocation5 + $0x80] sm:$0xff]  ;;  %v54_v16 = vld [vmem:[#allocation5 + $0x78] sm:$0xff]  ;;  %s610_s10 = smov [#allocation7]  }
  0x1d   :  { %437 = vmatpush3.msra.mxu0 %v40_v1  ;;  %444 = vmatpush3.msra.mxu1 %v57_v13  ;;  %v53_v17 = vld [vmem:[#allocation5 + $0x70] sm:$0xff]  ;;  %v52_v18 = vld [vmem:[#allocation5 + $0x68] sm:$0xff]  ;;  %v51_v19 = vld [vmem:[#allocation5 + $0x60] sm:$0xff]  ;;  %s384_s11 = sshll.u32 %s610_s10, 4  ;;  %s385_s11 = int_to_ptr.vmem [resolvable:$true] %s384_s11 }
  0x1e   :  { %438 = vmatprep.subr.mxu0 %v607_v0  ;;  %vm78_vm2 = vcmp.lt.s32.totalorder %v77_v5, 4  ;;  %445 = vmatprep.subr.mxu1 %v607_v0  ;;  %v50_v20 = vld [vmem:[#allocation5 + $0x58] sm:$0xff]  ;;  %v49_v21 = vld [vmem:[#allocation5 + $0x50] sm:$0xff]  ;;  %v48_v22 = vld [vmem:[#allocation5 + $0x48] sm:$0xff]  ;;  %s577_s12 = scalar_lea.vmem %s385_s11, 128  ;;  %p582_p11 = scmp.lt.s32.totalorder %s385_s11, %s385_s11 }
  0x1f   :  { %439 = vmatpush3.msra.mxu0 %v39_v2  ;;  %v640_v8 = vsel %vm78_vm2, 1.0, %v607_v0  ;;  %446 = vmatpush3.msra.mxu1 %v56_v14  ;;  %v47_v23 = vld [vmem:[#allocation5 + $0x40] sm:$0xff]  ;;  %v46_v24 = vld [vmem:[#allocation5 + $0x38] sm:$0xff]  ;;  %v45_v35 = vld [vmem:[#allocation5 + $0x30] sm:$0xff]  ;;  %p578_p10 = scmp.ne.s32.totalorder %s385_s11, %s577_s12  ;;  %p583_p12 = scmp.lt.s32.totalorder %s577_s12, %s577_s12 }
  0x20   :  { %441 = vmatmul.mubr.msk.f32.vlgmr.msra.gmra.mxu0 %vm85_vm1, %v38_v3  ;;  %478 = vmatprep.subr.mxu0 %v607_v0  ;;  %v44_v38 = vld [vmem:[#allocation5 + $0x28] sm:$0xff]  ;;  %v43_v40 = vld [vmem:[#allocation5 + $0x20] sm:$0xff]  ;;  %v42_v42 = vld [vmem:[#allocation5 + $0x18] sm:$0xff] }
  0x21   :  { %510 = vmatprep.mubr.msk.f32.mxu0 %vm608_vm0, %v607_v0  ;;  %447 = vmatprep.subr.mxu1 %v607_v0  ;;  %v397_v51 = vld [vmem:[#allocation5 + $0x98] ss:$0 sm:$0xff]  ;;  %v73_v58 = vld [vmem:[#allocation5 + $0x110] sm:$0xff]  ;;  %v72_v59 = vld [vmem:[#allocation5 + $0x108] sm:$0xff]  ;;  %p584_p13 = por %p583_p12, %p582_p11 }
  0x22   :  { %448 = vmatpush3.msra.mxu1 %v55_v15  ;;  %v74_v57 = vld [vmem:[#allocation5 + $0x118] sm:$0xff]  ;;  %v71_v60 = vld [vmem:[#allocation5 + $0x100] sm:$0xff]  ;;  %v69_v62 = vld [vmem:[#allocation5 + $0xf0] sm:$0xff] }
  0x23   :  { %449 = vmatprep.subr.mxu1 %v607_v0  ;;  %479 = vmatpush3.msra.mxu0 %v74_v57  ;;  %v70_v61 = vld [vmem:[#allocation5 + $0xf8] sm:$0xff]  ;;  %v68_v63 = vld [vmem:[#allocation5 + $0xe8] sm:$0xff]  ;;  %v67_v1 = vld [vmem:[#allocation5 + $0xe0] sm:$0xff]  ;;  %p585_p0 = pnand %p584_p13, %p578_p10 }
  0x24   :  { %450 = vmatpush3.msra.mxu1 %v54_v16  ;;  %480 = vmatprep.subr.mxu0 %v607_v0  ;;  %v66_v2 = vld [vmem:[#allocation5 + $0xd8] sm:$0xff]  ;;  %v65_v3 = vld [vmem:[#allocation5 + $0xd0] sm:$0xff]  ;;  %v64_v4 = vld [vmem:[#allocation5 + $0xc8] sm:$0xff] }
  0x25   :  { %451 = vmatprep.subr.mxu1 %v607_v0  ;;  %481 = vmatpush3.msra.mxu0 %v73_v58  ;;  %v63_v5 = vld [vmem:[#allocation5 + $0xc0] sm:$0xff]  ;;  %v62_v16 = vld [vmem:[#allocation5 + $0xb8] sm:$0xff] }
  0x26   :  { %452 = vmatpush3.msra.mxu1 %v53_v17  ;;  %482 = vmatprep.subr.mxu0 %v607_v0 }
  0x27   :  { %453 = vmatprep.subr.mxu1 %v607_v0  ;;  %483 = vmatpush3.msra.mxu0 %v72_v59 }
  0x28   :  { %454 = vmatpush3.msra.mxu1 %v52_v18  ;;  %484 = vmatprep.subr.mxu0 %v607_v0 }
  0x29   :  { %455 = vmatprep.subr.mxu1 %v607_v0  ;;  %485 = vmatpush3.msra.mxu0 %v71_v60 }
  0x2a   :  { %456 = vmatpush3.msra.mxu1 %v51_v19  ;;  %486 = vmatprep.subr.mxu0 %v607_v0  ;;  %v61_v19 = vld [vmem:[#allocation5 + $0xb0] sm:$0xff] }
  0x2b   :  { %457 = vmatprep.subr.mxu1 %v607_v0  ;;  %487 = vmatpush3.msra.mxu0 %v70_v61 }
  0x2c   :  { %458 = vmatpush3.msra.mxu1 %v50_v20  ;;  %488 = vmatprep.subr.mxu0 %v607_v0 }
  0x2d   :  { %459 = vmatprep.subr.mxu1 %v607_v0  ;;  %489 = vmatpush3.msra.mxu0 %v69_v62 }
  0x2e   :  { %460 = vmatpush3.msra.mxu1 %v49_v21  ;;  %490 = vmatprep.subr.mxu0 %v607_v0  ;;  %v60_v21 = vld [vmem:[#allocation5 + $0xa8] sm:$0xff] }
  0x2f   :  { %461 = vmatprep.subr.mxu1 %v607_v0  ;;  %491 = vmatpush3.msra.mxu0 %v68_v63 }
  0x30   :  { %462 = vmatpush3.msra.mxu1 %v48_v22  ;;  %492 = vmatprep.subr.mxu0 %v607_v0 }
  0x31   :  { %463 = vmatprep.subr.mxu1 %v607_v0  ;;  %493 = vmatpush3.msra.mxu0 %v67_v1 }
  0x32   :  { %464 = vmatpush3.msra.mxu1 %v47_v23  ;;  %494 = vmatprep.subr.mxu0 %v607_v0  ;;  %v59_v23 = vld [vmem:[#allocation5 + $0xa0] sm:$0xff] }
  0x33   :  { %465 = vmatprep.subr.mxu1 %v607_v0  ;;  %495 = vmatpush3.msra.mxu0 %v66_v2 }
  0x34   :  { %466 = vmatpush3.msra.mxu1 %v46_v24  ;;  %496 = vmatprep.subr.mxu0 %v607_v0 }
  0x35   :  { %467 = vmatprep.subr.mxu1 %v607_v0  ;;  %497 = vmatpush3.msra.mxu0 %v65_v3 }
  0x36   :  { %468 = vmatpush3.msra.mxu1 %v45_v35  ;;  %498 = vmatprep.subr.mxu0 %v607_v0 }
  0x37   :  { %469 = vmatprep.subr.mxu1 %v607_v0  ;;  %499 = vmatpush3.msra.mxu0 %v64_v4 }
  0x38   :  { %470 = vmatpush3.msra.mxu1 %v44_v38  ;;  %500 = vmatprep.subr.mxu0 %v607_v0 }
  0x39   :  { %471 = vmatprep.subr.mxu1 %v607_v0  ;;  %501 = vmatpush3.msra.mxu0 %v63_v5 }
  0x3a   :  { %472 = vmatpush3.msra.mxu1 %v43_v40  ;;  %502 = vmatprep.subr.mxu0 %v607_v0 }
  0x3b   :  { %473 = vmatprep.subr.mxu1 %v607_v0  ;;  %503 = vmatpush3.msra.mxu0 %v62_v16 }
  0x3c   :  { %474 = vmatpush3.msra.mxu1 %v42_v42  ;;  %504 = vmatprep.subr.mxu0 %v607_v0 }
  0x3d   :  { %505 = vmatpush3.msra.mxu0 %v61_v19 }
  0x3e   :  { %506 = vmatprep.subr.mxu0 %v607_v0 }
  0x3f   :  { %507 = vmatpush3.msra.mxu0 %v60_v21 }
  0x40   :  { %508 = vmatprep.subr.mxu0 %v607_v0 }
  0x41   :  { %509 = vmatpush3.msra.mxu0 %v59_v23 }
  0xe0   :  { %v155_v7 = vpop.f32.mrf.mxu0 }
  0xe1   :  { %v642_v9 = vadd.f32 %v395_v6, %v155_v7 }
  0xe2   :  { %v442_v10 = vpop.f32.mrf.mxu0 }
  0xe3   :  { %v159_v11 = vmul.f32 %v640_v8, %v642_v9 }
  0xe5   :  { %160 = vadd.xlane.f32.xlu0 %v159_v11  ;;  %v169_v12 = vmul.f32 %v159_v11, %v642_v9 }
  0xe9   :  { %170 = vadd.xlane.f32.xlu0 %v169_v12 }
 0x16e   :  { %v161_v25 = vpop.xlane.xlu0 %160 }
 0x16f   :  { %v162_v26 = vrot.slane %v161_v25, 4 }
 0x171   :  { %v163_v27 = vadd.f32 %v162_v26, %v161_v25 }
 0x172   :  { %v171_v28 = vpop.xlane.xlu0 %170 }
 0x173   :  { %v164_v29 = vrot.slane %v163_v27, 2  ;;  %v172_v30 = vrot.slane %v171_v28, 4 }
 0x175   :  { %v173_v31 = vadd.f32 %v172_v30, %v171_v28  ;;  %v165_v32 = vadd.f32 %v164_v29, %v163_v27 }
 0x177   :  { %v174_v33 = vrot.slane %v173_v31, 2  ;;  %v166_v34 = vrot.slane %v165_v32, 1 }
 0x179   :  { %v175_v36 = vadd.f32 %v174_v33, %v173_v31  ;;  %v167_v37 = vadd.f32 %v166_v34, %v165_v32  ;;  %v398_v31 = vld [vmem:[#allocation5 + $0x120] ss:$0 sm:$0xff] }
 0x17b   :  { %513 = vpush %v167_v37  ;;  %v176_v39 = vrot.slane %v175_v36, 1 }
 0x17d   :  { %v177_v41 = vadd.f32 %v176_v39, %v175_v36 }
 0x17f   :  { %515 = vpush %v177_v41 }
 0x1ac   :  { %s514_s0 = spop %513 }
 0x1ad   :  { %s179_s1 = smul.f32 0.001953125, %s514_s0 }
 0x1af   :  { %s181_s21 = smul.f32 %s179_s1, %s179_s1  ;;  %v184_v45 = vstv %s179_s1 }
 0x1b0   :  { %s516_s22 = spop %515  ;;  %v185_v46 = vsub.f32 %v642_v9, %v184_v45 }
 0x1b1   :  { %s180_s23 = smul.f32 0.001953125, %s516_s22 }
 0x1b3   :  { %s182_s24 = ssub.f32 %s180_s23, %s181_s21 }
 0x1b5   :  { %s183_s26 = smax.f32 %s609_s25, %s182_s24 }
 0x1b6   :  { %s186_s27 = sadd.f32 1e-05, %s183_s26 }
 0x1b8   :  { %v187_v43 = vstv %s186_s27 }
 0x1b9   :  { %533 = vrsqrt.f32 %v187_v43 }
 0x1c6   :  { %v534_v44 = vpop.eup %533 }
 0x1c7   :  { %517 = vpush %v534_v44 }
 0x1f8   :  { %s518_s28 = spop %517 }
 0x1f9   :  { %v190_v47 = vstv %s518_s28 }
 0x1fa   :  { %v191_v48 = vmul.f32 %v190_v47, %v185_v46 }
 0x1fc   :  { %v192_v49 = vmul.f32 0.01, %v191_v48 }
 0x1fe   :  { %v193_v50 = vmax.f32 %v191_v48, %v192_v49 }
 0x200   :  { %476 = vmatmul.mubr.f32.vlgmr.msra.gmra.mxu1 %v193_v50 }
 0x2c0   :  { %v264_v52 = vpop.f32.mrf.mxu1 }
 0x2c1   :  { %v664_v53 = vadd.f32 %v397_v51, %v264_v52 }
 0x2c2   :  { %v477_v54 = vpop.f32.mrf.mxu1 }
 0x2c3   :  { %v268_v55 = vmul.f32 %v640_v8, %v664_v53 }
 0x2c5   :  { %269 = vadd.xlane.f32.xlu1 %v268_v55  ;;  %v278_v56 = vmul.f32 %v268_v55, %v664_v53 }
 0x2c9   :  { %279 = vadd.xlane.f32.xlu1 %v278_v56 }
 0x34e   :  { %v270_v6 = vpop.xlane.xlu1 %269 }
 0x34f   :  { %v271_v7 = vrot.slane %v270_v6, 4 }
 0x351   :  { %v272_v8 = vadd.f32 %v271_v7, %v270_v6 }
 0x352   :  { %v280_v9 = vpop.xlane.xlu1 %279 }
 0x353   :  { %v273_v10 = vrot.slane %v272_v8, 2  ;;  %v281_v11 = vrot.slane %v280_v9, 4 }
 0x355   :  { %v282_v12 = vadd.f32 %v281_v11, %v280_v9  ;;  %v274_v13 = vadd.f32 %v273_v10, %v272_v8 }
 0x357   :  { %v283_v14 = vrot.slane %v282_v12, 2  ;;  %v275_v15 = vrot.slane %v274_v13, 1 }
 0x359   :  { %v284_v17 = vadd.f32 %v283_v14, %v282_v12  ;;  %v276_v18 = vadd.f32 %v275_v15, %v274_v13 }
 0x35b   :  { %519 = vpush %v276_v18  ;;  %v285_v20 = vrot.slane %v284_v17, 1 }
 0x35d   :  { %v286_v22 = vadd.f32 %v285_v20, %v284_v17 }
 0x35f   :  { %521 = vpush %v286_v22 }
 0x38c   :  { %s520_s29 = spop %519 }
 0x38d   :  { %s288_s30 = smul.f32 0.001953125, %s520_s29 }
 0x38f   :  { %s290_s3 = smul.f32 %s288_s30, %s288_s30  ;;  %v293_v26 = vstv %s288_s30 }
 0x390   :  { %s522_s4 = spop %521  ;;  %v294_v27 = vsub.f32 %v664_v53, %v293_v26 }
 0x391   :  { %s289_s5 = smul.f32 0.001953125, %s522_s4 }
 0x393   :  { %s291_s6 = ssub.f32 %s289_s5, %s290_s3 }
 0x395   :  { %s292_s7 = smax.f32 %s609_s25, %s291_s6 }
 0x396   :  { %s295_s8 = sadd.f32 1e-05, %s292_s7 }
 0x398   :  { %v296_v24 = vstv %s295_s8 }
 0x399   :  { %535 = vrsqrt.f32 %v296_v24 }
 0x3a6   :  { %v536_v25 = vpop.eup %535 }
 0x3a7   :  { %523 = vpush %v536_v25 }
 0x3d8   :  { %s524_s9 = spop %523 }
 0x3d9   :  { %v299_v0 = vstv %s524_s9 }
 0x3da   :  { %v300_v28 = vmul.f32 %v299_v0, %v294_v27 }
 0x3dc   :  { %v301_v29 = vmul.f32 0.01, %v300_v28 }
 0x3de   :  { %v302_v30 = vmax.f32 %v300_v28, %v301_v29 }
 0x3e0   :  { %511 = vmatmul.mubr.f32.vlgmr.msra.gmra.mxu0 %v302_v30 }
 0x4a0   :  { %v373_v32 = vpop.f32.mrf.mxu0 }
 0x4a1   :  { %v374_v33 = vadd.f32 %v398_v31, %v373_v32 }
 0x4a2   :  { %v512_v34 = vpop.f32.mrf.mxu0 }
 0x4a3   :  { %377 = vst [vmem:[#allocation7] sm:$0xff] %v374_v33 }
 0x4a4   :  { %588 = shalt.err (!%p585_p0)
}
 0x4a5   :  { %387 = dma.vmem_to_hbm [thread:$0]  %s385_s11, 128, %s691_s2, [#allocation4]  }
 0x4a6   :  { %601 = dma.done.wait [#allocation4], 128  }
 0x4a7   :  { %602 = vsyncadd [#allocation4], 4294967168 }
 0x4a8   :  { %391 = vsyncpa [#allocation3], 1 }
 0x4a9   :  { %392 = vsyncpa [#allocation6], 1 }
 0x4aa   :  { %393 = vsyncpa [#allocation4], 1 }

</bundles_post_ra>
